<compile_context>
chip_gen: v6e
topology: v6e:2x2x1
jax: 0.10.0
libtpu: 0.0.40
codegen_flags: <defaults>
</compile_context>

<pallas_src>
import jax
import jax.numpy as jnp
from jax.experimental import pallas as pl
from jax.experimental.pallas import tpu as pltpu


def _swish_kernel(beta_ref, x_ref, o_ref):
    # beta_ref: (1,) scalar in SMEM.  x_ref/o_ref: (tile_rows, lane) VMEM tiles.
    beta = beta_ref[0]
    x = x_ref[...].astype(jnp.float32)
    o_ref[...] = (x * jax.nn.sigmoid(beta * x)).astype(o_ref.dtype)


def _flatten_lane_dense(x, lane_candidates=(2048, 1024, 512, 256, 128)):
    """Flatten to (rows, L) with L a multiple of 128. Returns (x2d, total, pad)."""
    total = x.size
    flat = x.reshape(-1)
    # Prefer an L that divides total exactly and still leaves >= 8 rows.
    for L in lane_candidates:
        if total % L == 0 and total // L >= 8:
            return flat.reshape(total // L, L), total, 0
    for L in lane_candidates:
        if total % L == 0:
            return flat.reshape(total // L, L), total, 0
    # Pad only the tiny flat tail (< L elements), not whole rows.
    L = 512 if total >= 512 else 128
    pad = (-total) % L
    flat = jnp.pad(flat, (0, pad))
    return flat.reshape((total + pad) // L, L), total, pad


def _choose_tile_rows(rows, lane, itemsize):
    """Pick a sublane-aligned row tile ~2 MiB; keep >=2 grid steps when possible."""
    sublane = {4: 8, 2: 16, 1: 32}.get(itemsize, 8)
    if rows <= sublane:
        return rows  # single block equal to the full dim (allowed by Pallas)
    target_bytes = 2 * 1024 * 1024  # 4 x 2 MiB fits v5e's 16 MiB scoped VMEM
    tr = max(sublane, (target_bytes // (lane * itemsize)) // sublane * sublane)
    # Cap so the (single) grid axis has at least 2 steps -> both v7x TCs busy.
    half = (rows // 2) // sublane * sublane
    if half >= sublane:
        tr = min(tr, half)
    tr = min(tr, rows)
    if tr != rows and tr % sublane:
        tr = max(sublane, (tr // sublane) * sublane)
    return tr


def swish(x, beta):
    """Swish forward: x * sigmoid(beta * x). Works for any input rank/shape."""
    orig_shape = x.shape
    orig_dtype = x.dtype

    x2d, total, pad = _flatten_lane_dense(x)
    rows, lane = x2d.shape
    tr = _choose_tile_rows(rows, lane, jnp.dtype(orig_dtype).itemsize)
    grid = (pl.cdiv(rows, tr),)

    beta_arr = jnp.asarray(beta, dtype=jnp.float32).reshape(1)

    out2d = pl.pallas_call(
        _swish_kernel,
        out_shape=jax.ShapeDtypeStruct((rows, lane), orig_dtype),
        grid_spec=pl.GridSpec(
            grid=grid,
            in_specs=[
                pl.BlockSpec(memory_space=pltpu.SMEM),        # beta scalar
                pl.BlockSpec((tr, lane), lambda i: (i, 0)),   # x tile
            ],
            out_specs=pl.BlockSpec((tr, lane), lambda i: (i, 0)),
        ),
        compiler_params=pltpu.CompilerParams(
            dimension_semantics=("parallel",),
        ),
    )(beta_arr, x2d)

    flat = out2d.reshape(-1)
    if pad:
        flat = flat[:total]
    return flat.reshape(orig_shape)


if __name__ == "__main__":
    key = jax.random.PRNGKey(0)
    x = jax.random.normal(key, (2, 4, 16, 16), dtype=jnp.float32)  # NCHW

    # Deterministic parameter init, matching torch.nn.Parameter(torch.tensor(1.0))
    beta = jnp.float32(1.0)

    out = swish(x, beta)
    out = jax.block_until_ready(out)

    # Sanity check against plain-JAX reference.
    ref = x * jax.nn.sigmoid(beta * x)
    assert out.shape == x.shape and out.dtype == x.dtype
    assert jnp.allclose(out, ref, atol=1e-6, rtol=1e-6)

    print("KERNEL_OK")
</pallas_src>

<mosaic_0001>
module attributes {stable_mosaic.version = 11 : i64} {
  func.func @_swish_kernel(%arg0: i32, %arg1: memref<1xf32, #tpu.memory_space<smem>>, %arg2: memref<8x256xf32, #tpu.memory_space<vmem>>, %arg3: memref<8x256xf32, #tpu.memory_space<vmem>>) attributes {dimension_semantics = [#tpu.dimension_semantics<parallel>], iteration_bounds = array<i64: 1>, scalar_prefetch = 0 : i64, scratch_operands = 0 : i64, tpu.core_type = #tpu.core_type<tc>, window_params = [{transform_indices = @transform_0, window_bounds = array<i64: 1>}, {transform_indices = @transform_1, window_bounds = array<i64: 8, 256>}, {transform_indices = @transform_2, window_bounds = array<i64: 8, 256>}]} {
    %c0 = arith.constant 0 : index
    %0 = memref.load %arg1[%c0] : memref<1xf32, #tpu.memory_space<smem>>
    %c0_0 = arith.constant 0 : index
    %c0_1 = arith.constant 0 : index
    %1 = vector.load %arg2[%c0_0, %c0_1] : memref<8x256xf32, #tpu.memory_space<vmem>>, vector<8x256xf32>
    %2 = vector.broadcast %0 : f32 to vector<8x256xf32>
    %3 = arith.mulf %2, %1 : vector<8x256xf32>
    %4 = arith.negf %3 : vector<8x256xf32>
    %5 = math.exp %4 : vector<8x256xf32>
    %cst = arith.constant 1.000000e+00 : f32
    %6 = vector.broadcast %cst : f32 to vector<8x256xf32>
    %7 = arith.addf %6, %5 : vector<8x256xf32>
    %8 = arith.divf %6, %7 : vector<8x256xf32>
    %9 = arith.mulf %1, %8 : vector<8x256xf32>
    %c0_2 = arith.constant 0 : index
    %c0_3 = arith.constant 0 : index
    %10 = vector.load %arg3[%c0_2, %c0_3] : memref<8x256xf32, #tpu.memory_space<vmem>>, vector<8x256xf32>
    tpu.vector_store %arg3[%c0_2, %c0_3], %9 {strides = array<i32>} : memref<8x256xf32, #tpu.memory_space<vmem>>, vector<8x256xf32>,
    return
  }
  func.func @transform_0(%arg0: i32) -> i32 {
    %c0_i32 = arith.constant 0 : i32
    %c0_i32_0 = arith.constant 0 : i32
    return %c0_i32 : i32
  }
  func.func @transform_1(%arg0: i32) -> (i32, i32) {
    %c0_i32 = arith.constant 0 : i32
    %c0_i32_0 = arith.constant 0 : i32
    return %arg0, %c0_i32 : i32, i32
  }
  func.func @transform_2(%arg0: i32) -> (i32, i32) {
    %c0_i32 = arith.constant 0 : i32
    %c0_i32_0 = arith.constant 0 : i32
    return %arg0, %c0_i32 : i32, i32
  }
}

</mosaic_0001>

<bundles_post_ra>
// kernel: tpu_custom_call.1
= control target key start
LH: loop header
LB: loop body
LE: loop exit
PB: predicated region body
PF: predicated region fallthrough
CT: control target
= control target key end

     0   :  { %8 = vsyncpa [#allocation4], 0  ;;  %s144_s0 = inlined_call_operand.<no memory space> [shape: f32[1], index: 0, kind: input, shape index: {}]   ;;  %s145_s1 = inlined_call_operand.hbm [shape: f32[8,256], index: 1, kind: input, shape index: {}]   ;;  %s146_s2 = inlined_call_operand.hbm [shape: f32[8,256], index: 2, kind: output, shape index: {}]  }
   0x1   :  { %9 = vsyncpa [#allocation5], 0  ;;  %s118_s9 = smov [#allocation3]  }
   0x2   :  { %s18_s10 = sshll.u32 %s118_s9, 4  ;;  %s19_s10 = int_to_ptr.vmem [resolvable:$true] %s18_s10 }
   0x3   :  { %s82_s11 = scalar_lea.vmem %s19_s10, 256  ;;  %p87_p1 = scmp.lt.s32.totalorder %s19_s10, %s19_s10 }
   0x4   :  { %p83_p0 = scmp.ne.s32.totalorder %s19_s10, %s82_s11  ;;  %p88_p2 = scmp.lt.s32.totalorder %s82_s11, %s82_s11 }
   0x6   :  { %p89_p3 = por %p88_p2, %p87_p1 }
   0x8   :  { %p90_p4 = pnand %p89_p3, %p83_p0 }
   0xa   :  { %93 = shalt.err (!%p90_p4)
}
   0xb   :  { %21 = dma.hbm_to_vmem [thread:$0]  %s145_s1, 256, %s19_s10, [#allocation4]  }
   0xc   :  { %114 = dma.done.wait [#allocation4], 256  }
   0xd   :  { %115 = vsyncadd [#allocation4], 4294967040  ;;  %v28_v0 = vstv %s144_s0  ;;  %v26_v1 = vld [vmem:[#allocation3] sm:$0xff]  ;;  %v27_v2 = vld [vmem:[#allocation3 + $0x8] sm:$0xff]  ;;  %s119_s1 = smov [#allocation6]  }
   0xe   :  { %v29_v3 = vmul.f32 %v28_v0, %v26_v1  ;;  %v30_v4 = vmul.f32 %v28_v0, %v27_v2  ;;  %s53_s16 = sshll.u32 %s119_s1, 4  ;;  %s54_s16 = int_to_ptr.vmem [resolvable:$true] %s53_s16 }
   0xf   :  { %s94_s0 = scalar_lea.vmem %s54_s16, 256  ;;  %p99_p6 = scmp.lt.s32.totalorder %s54_s16, %s54_s16 }
  0x10   :  { %v62_v5 = vmul.f32 -1.442695, %v29_v3  ;;  %v63_v6 = vmul.f32 -1.442695, %v30_v4  ;;  %p95_p5 = scmp.ne.s32.totalorder %s54_s16, %s94_s0  ;;  %p100_p7 = scmp.lt.s32.totalorder %s94_s0, %s94_s0 }
  0x12   :  { %66 = vpow2.f32 %v62_v5  ;;  %p101_p8 = por %p100_p7, %p99_p6 }
  0x13   :  { %68 = vpow2.f32 %v63_v6 }
  0x14   :  { %p102_p9 = pnand %p101_p8, %p95_p5 }
  0x1f   :  { %v67_v7 = vpop.eup %66 }
  0x20   :  { %v69_v8 = vpop.eup %68  ;;  %v37_v9 = vadd.f32 1.0, %v67_v7 }
  0x21   :  { %v38_v10 = vadd.f32 1.0, %v69_v8 }
  0x22   :  { %70 = vrcp.f32 %v37_v9 }
  0x23   :  { %72 = vrcp.f32 %v38_v10 }
  0x2f   :  { %v71_v11 = vpop.eup %70 }
  0x30   :  { %v73_v12 = vpop.eup %72  ;;  %v43_v13 = vmul.f32 %v71_v11, %v26_v1 }
  0x31   :  { %v44_v14 = vmul.f32 %v73_v12, %v27_v2 }
  0x32   :  { %45 = vst [vmem:[#allocation6] sm:$0xff] %v43_v13 }
  0x33   :  { %46 = vst [vmem:[#allocation6 + $0x8] sm:$0xff] %v44_v14 }
  0x34   :  { %105 = shalt.err (!%p102_p9)
}
  0x35   :  { %56 = dma.vmem_to_hbm [thread:$0]  %s54_s16, 256, %s146_s2, [#allocation5]  }
  0x36   :  { %116 = dma.done.wait [#allocation5], 256  }
  0x37   :  { %117 = vsyncadd [#allocation5], 4294967040 }
  0x38   :  { %60 = vsyncpa [#allocation4], 1 }
  0x39   :  { %61 = vsyncpa [#allocation5], 1 }

</bundles_post_ra>
